<compile_context>
chip_gen: v7x
topology: tpu7x:2x2x1
jax: 0.10.0
libtpu: 0.0.40
codegen_flags: <defaults>
</compile_context>

<pallas_src>
import functools

import jax
import jax.numpy as jnp
from jax.experimental import pallas as pl
from jax.experimental.pallas import tpu as pltpu


_LANES = 512             # lane width of the flattened layout (multiple of 128)
_MAX_BLOCK_ROWS = 1024   # rows of _LANES f32 per grid step (~2 MiB per plane)


def _spectral_filter_kernel(log, x_ref, f_ref, o_ref):
    """Elementwise spectral filtering on one lane-dense block.

    x_ref / o_ref: (1, 2, rb, L) float32 -- [:,0] real plane, [:,1] imag plane.
    f_ref:         (rb, L)       float32 -- batch-shared Fourier filter block.
    """
    x = x_ref[...]
    w = jnp.maximum(f_ref[...], 0.0)                  # ReLU(filter)
    if log:
        re = x[0, 0]
        im = x[0, 1]
        mag2 = re * re + im * im
        inv = jax.lax.rsqrt(mag2 + 1e-32)             # ~1/mag, single EUP op
        mag = mag2 * inv                              # init_spectrum
        spec = jnp.expm1(w * jnp.log1p(mag))          # (1 + mag)^w - 1
        scale = spec * inv                            # phase-preserving rescale
    else:
        # Linear path: (w*mag)/(mag+1e-16) == w up to a <=1e-16 relative term,
        # so skip sqrt and divide entirely.
        scale = w
    o_ref[...] = x * scale[None, None]                # scale both re & im planes


def _choose_rows(rows_min):
    """Pick (padded_rows, rows_per_block).

    rows_per_block is a multiple of 8 (full sublanes), <= _MAX_BLOCK_ROWS,
    chosen to minimize total padded rows (ties broken toward bigger blocks,
    i.e. fewer grid steps).  rows_per_block need not be >=128; it just must
    not blow up padding (avoids the old 536 -> 1024 pathology).
    """
    rows8 = -(-rows_min // 8) * 8
    cap = min(rows8, _MAX_BLOCK_ROWS)
    best_rb, best_rows = 8, rows8
    for rb in range(16, cap + 1, 8):
        rows = -(-rows8 // rb) * rb
        if rows < best_rows or (rows == best_rows and rb > best_rb):
            best_rb, best_rows = rb, rows
    return best_rows, best_rb


def _spectral_filter_pallas(re_im, filt, rows_block, log):
    """re_im: (B, 2, rows, lanes) f32; filt: (rows, lanes) f32."""
    B, _, rows, lanes = re_im.shape
    n_r = rows // rows_block

    # VMEM budget derived from the chosen block: double-buffered input (2
    # planes) + output (2 planes) + filter (1 plane) + compiler headroom.
    # Capped at 48 MiB (v7x has 64 MiB physical VMEM per TC).
    block_bytes = rows_block * lanes * 4
    vmem_bytes = 2 * (2 + 2 + 1) * block_bytes + (4 << 20)
    vmem_bytes = int(min(max(vmem_bytes, 16 << 20), 48 << 20))

    kern = functools.partial(_spectral_filter_kernel, log)
    grid_spec = pltpu.PrefetchScalarGridSpec(
        num_scalar_prefetch=0,
        grid=(n_r, B),                       # B innermost -> filter DMA skipped
        in_specs=[
            pl.BlockSpec((1, 2, rows_block, lanes), lambda r, b: (b, 0, r, 0)),
            pl.BlockSpec((rows_block, lanes), lambda r, b: (r, 0)),
        ],
        out_specs=pl.BlockSpec((1, 2, rows_block, lanes),
                               lambda r, b: (b, 0, r, 0)),
    )
    out = pl.pallas_call(
        kern,
        out_shape=jax.ShapeDtypeStruct((B, 2, rows, lanes), jnp.float32),
        grid_spec=grid_spec,
        # Filter the spectrum in place.  Safe only because re_im is a
        # jit-internal intermediate (never a caller-owned buffer).
        input_output_aliases={0: 0},
        compiler_params=pltpu.CompilerParams(
            dimension_semantics=("parallel", "parallel"),
            vmem_limit_bytes=vmem_bytes,
        ),
    )(re_im, filt)
    return out


def linear_fourier2d(x, fourier_filter, log):
    """Forward pass of LinearFourier2d.

    x:              (B, C, H, W) float32, NCHW
    fourier_filter: (C, H, W//2 + 1) float32
    """
    B, C, H, W = x.shape
    Wf = W // 2 + 1
    P = C * H * Wf

    # old torch.rfft(signal_ndim=3, normalized=True, onesided=True)
    #   == ortho-normalized rfftn over (C, H, W)
    xf = jnp.fft.rfftn(x.astype(jnp.float32), axes=(1, 2, 3), norm="ortho")

    lanes = _LANES
    rows, rows_block = _choose_rows(-(-P // lanes))
    p_pad = rows * lanes

    # Write real/imag straight into a preallocated, zero-padded lane-dense
    # buffer (fuses the stack + pad into the dynamic-update-slice writes).
    re_im = jnp.zeros((B, 2, p_pad), dtype=jnp.float32)
    re_im = re_im.at[:, 0, :P].set(jnp.real(xf).reshape(B, P))
    re_im = re_im.at[:, 1, :P].set(jnp.imag(xf).reshape(B, P))
    re_im = re_im.reshape(B, 2, rows, lanes)

    filt = fourier_filter.astype(jnp.float32).reshape(P)
    if p_pad != P:
        filt = jnp.pad(filt, (0, p_pad - P))
    filt = filt.reshape(rows, lanes)

    out = _spectral_filter_pallas(re_im, filt, rows_block, log)  # (B,2,rows,L)

    out = out.reshape(B, 2, p_pad)[:, :, :P].reshape(B, 2, C, H, Wf)
    yf = jax.lax.complex(out[:, 0], out[:, 1])
    # old torch.irfft(signal_ndim=3, normalized=True, onesided=True,
    #                 signal_sizes=(C, H, W))
    y = jnp.fft.irfftn(yf, s=(C, H, W), axes=(1, 2, 3), norm="ortho")
    return y.astype(x.dtype)


def _reference(x, fourier_filter, log):
    """Pure-JAX reference (no Pallas), faithful to the torch formula."""
    B, C, H, W = x.shape
    xf = jnp.fft.rfftn(x, axes=(1, 2, 3), norm="ortho")
    re, im = jnp.real(xf), jnp.imag(xf)
    w = jnp.maximum(fourier_filter, 0.0)[None]
    mag = jnp.sqrt(re * re + im * im)
    spec = jnp.exp(w * jnp.log1p(mag)) - 1.0 if log else w * mag
    scale = spec / (mag + 1e-16)
    return jnp.fft.irfftn((re * scale) + 1j * (im * scale),
                          s=(C, H, W), axes=(1, 2, 3), norm="ortho")


if __name__ == "__main__":
    B, C, H, W = 2, 4, 16, 16
    Wf = W // 2 + 1

    key = jax.random.PRNGKey(0)
    kx, kf = jax.random.split(key)
    x = jax.random.normal(kx, (B, C, H, W), dtype=jnp.float32)
    # torch.nn.init.ones_(self.fourier_filter)
    ones_filter = jnp.ones((C, H, Wf), dtype=jnp.float32)
    # also exercise the ReLU with mixed-sign filter values
    rand_filter = jax.random.normal(kf, (C, H, Wf), dtype=jnp.float32)

    ok = True
    for log in (False, True):
        fwd = jax.jit(functools.partial(linear_fourier2d, log=log))
        for filt in (ones_filter, rand_filter):
            y = jax.block_until_ready(fwd(x, filt))
            y_ref = jax.block_until_ready(_reference(x, filt, log))
            assert y.shape == (B, C, H, W), y.shape
            if not jnp.allclose(y, y_ref, atol=1e-4, rtol=1e-4):
                ok = False
        # sanity: ones filter with log=False is (numerically) the identity
        if not log:
            y_id = jax.block_until_ready(fwd(x, ones_filter))
            if not jnp.allclose(y_id, x, atol=1e-4, rtol=1e-4):
                ok = False

    if ok:
        print("KERNEL_OK")
</pallas_src>

<mosaic_0001>
module attributes {stable_mosaic.version = 11 : i64} {
  func.func @_spectral_filter_kernel(%arg0: i32, %arg1: i32, %arg2: memref<1x2x8x512xf32, #tpu.memory_space<vmem>>, %arg3: memref<8x512xf32, #tpu.memory_space<vmem>>, %arg4: memref<1x2x8x512xf32, #tpu.memory_space<vmem>>) attributes {dimension_semantics = [#tpu.dimension_semantics<parallel>, #tpu.dimension_semantics<parallel>], iteration_bounds = array<i64: 1, 2>, scalar_prefetch = 0 : i64, scratch_operands = 0 : i64, tpu.core_type = #tpu.core_type<tc>, window_params = [{transform_indices = @transform_0, window_bounds = array<i64: 1, 2, 8, 512>}, {transform_indices = @transform_1, window_bounds = array<i64: 8, 512>}, {transform_indices = @transform_2, window_bounds = array<i64: 1, 2, 8, 512>}]} {
    %c0 = arith.constant 0 : index
    %c0_0 = arith.constant 0 : index
    %c0_1 = arith.constant 0 : index
    %c0_2 = arith.constant 0 : index
    %0 = vector.load %arg2[%c0, %c0_0, %c0_1, %c0_2] : memref<1x2x8x512xf32, #tpu.memory_space<vmem>>, vector<1x2x8x512xf32>
    %c0_3 = arith.constant 0 : index
    %c0_4 = arith.constant 0 : index
    %1 = vector.load %arg3[%c0_3, %c0_4] : memref<8x512xf32, #tpu.memory_space<vmem>>, vector<8x512xf32>
    %cst = arith.constant 0.000000e+00 : f32
    %2 = vector.broadcast %cst : f32 to vector<8x512xf32>
    %3 = arith.maximumf %1, %2 : vector<8x512xf32>
    %4 = vector.shape_cast %3 : vector<8x512xf32> to vector<1x1x8x512xf32>
    %5 = vector.broadcast %4 : vector<1x1x8x512xf32> to vector<1x2x8x512xf32>
    %6 = arith.mulf %0, %5 : vector<1x2x8x512xf32>
    %c0_5 = arith.constant 0 : index
    %c0_6 = arith.constant 0 : index
    %c0_7 = arith.constant 0 : index
    %c0_8 = arith.constant 0 : index
    %7 = vector.load %arg4[%c0_5, %c0_6, %c0_7, %c0_8] : memref<1x2x8x512xf32, #tpu.memory_space<vmem>>, vector<1x2x8x512xf32>
    tpu.vector_store %arg4[%c0_5, %c0_6, %c0_7, %c0_8], %6 {strides = array<i32>} : memref<1x2x8x512xf32, #tpu.memory_space<vmem>>, vector<1x2x8x512xf32>,
    return
  }
  func.func @transform_0(%arg0: i32, %arg1: i32) -> (i32, i32, i32, i32) {
    %c0_i32 = arith.constant 0 : i32
    %c0_i32_0 = arith.constant 0 : i32
    %c0_i32_1 = arith.constant 0 : i32
    return %arg1, %c0_i32, %arg0, %c0_i32_0 : i32, i32, i32, i32
  }
  func.func @transform_1(%arg0: i32, %arg1: i32) -> (i32, i32) {
    %c0_i32 = arith.constant 0 : i32
    %c0_i32_0 = arith.constant 0 : i32
    return %arg0, %c0_i32 : i32, i32
  }
  func.func @transform_2(%arg0: i32, %arg1: i32) -> (i32, i32, i32, i32) {
    %c0_i32 = arith.constant 0 : i32
    %c0_i32_0 = arith.constant 0 : i32
    %c0_i32_1 = arith.constant 0 : i32
    return %arg1, %c0_i32, %arg0, %c0_i32_0 : i32, i32, i32, i32
  }
}

</mosaic_0001>

<bundles_post_ra>
// kernel: linear_fourier2d.1
= control target key start
LH: loop header
LB: loop body
LE: loop exit
PB: predicated region body
PF: predicated region fallthrough
CT: control target
= control target key end

     0   :  { %s417_s9 = smov 0   ;;  %s419_s10 = smov 0   ;;  %s462_s0 = inlined_call_operand.vmem [shape: f32[2,2,8,512], index: 0, kind: input, shape index: {}, may-alias: {0,2}]   ;;  %s463_s1 = inlined_call_operand.vmem [shape: f32[8,512], index: 1, kind: input, shape index: {}]   ;;  %s464_s2 = inlined_call_operand.vmem [shape: f32[2,2,8,512], index: 2, kind: output, shape index: {}, may-alias: {0,2}]  }
   0x1   :  { %s421_s11 = smov 0  }
   0x2 LB: > { %s21_s12 = sadd.s32 1, %s396_s10  ;;  %p345_p0 = scmp.ge.s32.totalorder %s400_s11, 1  ;;  %s400_s11 = sphi %s421_s11, %s12_s11   ;;  %s396_s10 = sphi %s419_s10, %s466_s10   ;;  %s392_s9 = sphi %s417_s9, %s465_s9  }
   0x3   : > { %p22_p1 = scmp.ge.s32.totalorder %s21_s12, 2  ;;  %p142_p2 = scmp.lt.s32.totalorder %s400_s11, 3 }
   0x5   : > { %s468_s12 = smov (%p22_p1, %s21_s12), 0  ;;  %p143_p3 = pnand %p345_p0, %p142_p2 }
   0x6   : > { %p177_p4 = scmp.lt.s32.totalorder (!%p143_p3), %s392_s9, 1  ;;  %v208_v0 = vld [vmem:[%s463_s1] sm:$0xff] (!%p143_p3)  ;;  %v209_v1 = vld [vmem:[%s463_s1 + $0x8] sm:$0xff] (!%p143_p3)  ;;  %v210_v2 = vld [vmem:[%s463_s1 + $0x10] sm:$0xff] (!%p143_p3) }
   0x7   : > { %146 = sbr.rel (%p143_p3) target bundleno = 24 (0x18), region = 28  ;;  %v211_v3 = vld [vmem:[%s463_s1 + $0x18] sm:$0xff] (!%p143_p3)  ;;  %v212_v4 = vmax.f32 (!%p143_p3), %v208_v0, 0.0  ;;  %v213_v5 = vmax.f32 (!%p143_p3), %v209_v1, 0.0  ;;  %v214_v6 = vmax.f32 (!%p143_p3), %v210_v2, 0.0 }
   0x8   : > { %v215_v7 = vmax.f32 (!%p143_p3), %v211_v3, 0.0 }
   0xe   : > { %s470_s9 = smov (!%p177_p4, %s392_s9), 1 }
   0xf   : > { %s352_s21 = sshll.u32 %s470_s9, 6 }
  0x10   : > { %s185_s24 = scalar_lea.vmem %s462_s0, %s352_s21  ;;  %s199_s27 = scalar_lea.vmem %s464_s2, %s352_s21 }
  0x11   : > { %v200_v8 = vld [vmem:[%s185_s24] sm:$0xff]  ;;  %v201_v9 = vld [vmem:[%s185_s24 + $0x8] sm:$0xff]  ;;  %v202_v10 = vld [vmem:[%s185_s24 + $0x10] sm:$0xff] }
  0x12   : > { %v203_v11 = vld [vmem:[%s185_s24 + $0x18] sm:$0xff]  ;;  %v204_v12 = vld [vmem:[%s185_s24 + $0x20] sm:$0xff]  ;;  %v205_v13 = vld [vmem:[%s185_s24 + $0x28] sm:$0xff]  ;;  %v216_v14 = vmul.f32 %v212_v4, %v200_v8  ;;  %v217_v15 = vmul.f32 %v213_v5, %v201_v9  ;;  %v218_v16 = vmul.f32 %v214_v6, %v202_v10 }
  0x13   : > { %v206_v17 = vld [vmem:[%s185_s24 + $0x30] sm:$0xff]  ;;  %v207_v18 = vld [vmem:[%s185_s24 + $0x38] sm:$0xff]  ;;  %v219_v19 = vmul.f32 %v215_v7, %v203_v11  ;;  %v220_v20 = vmul.f32 %v212_v4, %v204_v12  ;;  %v221_v21 = vmul.f32 %v213_v5, %v205_v13 }
  0x14   : > { %v222_v22 = vmul.f32 %v214_v6, %v206_v17  ;;  %v223_v23 = vmul.f32 %v215_v7, %v207_v18  ;;  %224 = vst [vmem:[%s199_s27] sm:$0xff] %v216_v14  ;;  %225 = vst [vmem:[%s199_s27 + $0x8] sm:$0xff] %v217_v15 }
  0x15   : > { %226 = vst [vmem:[%s199_s27 + $0x10] sm:$0xff] %v218_v16  ;;  %227 = vst [vmem:[%s199_s27 + $0x18] sm:$0xff] %v219_v19 }
  0x16   : > { %228 = vst [vmem:[%s199_s27 + $0x20] sm:$0xff] %v220_v20  ;;  %229 = vst [vmem:[%s199_s27 + $0x28] sm:$0xff] %v221_v21 }
  0x17   : > { %230 = vst [vmem:[%s199_s27 + $0x30] sm:$0xff] %v222_v22  ;;  %231 = vst [vmem:[%s199_s27 + $0x38] sm:$0xff] %v223_v23 }
  0x18 PF: > { %s12_s11 = sadd.s32 1, %s400_s11   ;;  %s465_s9 = smov %s396_s10 }
  0x19   : > { %p9_p5 = scmp.ge.s32.totalorder %s12_s11, 4   ;;  %s466_s10 = smov %s468_s12 }
  0x1b   :  { %11 = sbr.rel (!%p9_p5) target bundleno = 2 (0x2), region = 61 }

// kernel: reverse.0
= control target key start
LH: loop header
LB: loop body
LE: loop exit
PB: predicated region body
PF: predicated region fallthrough
CT: control target
= control target key end

     0   :  { %v71_v3 = vlaneseq  ;;  %v64_v9 = vld [vmem:[#allocation0 + $0x7] ss:$-1 sm:$0xff]  ;;  %v78_v12 = vld [vmem:[#allocation0 + $0x17] ss:$-1 sm:$0xff]  ;;  %s329_s0 = inlined_call_operand.vmem [shape: f32[2,4,16,7], index: 0, kind: input, shape index: {}]   ;;  %s330_s1 = inlined_call_operand.vmem [shape: f32[2,4,16,7], index: 1, kind: output, shape index: {}]  }
   0x1   :  { %v44_v0 = vld [vmem:[%s329_s0] sm:$0xff]  ;;  %v46_v1 = vld [vmem:[%s329_s0 + $0x8] sm:$0xff]  ;;  %v48_v2 = vld [vmem:[%s329_s0 + $0x10] sm:$0xff]  ;;  %v65_v10 = vrot.slane %v64_v9, 1  ;;  %v79_v14 = vrot.slane %v78_v12, 1 }
   0x2   :  { %45 = vst [vmem:[#allocation0 + $0x8] sm:$0xff] %v44_v0  ;;  %47 = vst [vmem:[#allocation0 + $0x18] sm:$0xff] %v46_v1  ;;  %v50_v4 = vld [vmem:[%s329_s0 + $0x18] sm:$0xff]  ;;  %v52_v5 = vld [vmem:[%s329_s0 + $0x20] sm:$0xff]  ;;  %v72_v11 = vshrl.u32 %v71_v3, 7 }
   0x3   :  { %49 = vst [vmem:[#allocation0 + $0x28] sm:$0xff] %v48_v2  ;;  %v54_v6 = vld [vmem:[%s329_s0 + $0x28] sm:$0xff]  ;;  %51 = vst [vmem:[#allocation0 + $0x38] sm:$0xff] %v50_v4  ;;  %v56_v7 = vld [vmem:[%s329_s0 + $0x30] sm:$0xff] }
   0x4   :  { %53 = vst [vmem:[#allocation0 + $0x48] sm:$0xff] %v52_v5  ;;  %55 = vst [vmem:[#allocation0 + $0x58] sm:$0xff] %v54_v6  ;;  %v58_v8 = vld [vmem:[%s329_s0 + $0x38] sm:$0xff]  ;;  %v92_v13 = vld [vmem:[#allocation0 + $0x27] ss:$-1 sm:$0xff]  ;;  %vm73_vm0 = vcmp.lt.s32.totalorder %v72_v11, 7 }
   0x5   :  { %57 = vst [vmem:[#allocation0 + $0x68] sm:$0xff] %v56_v7  ;;  %59 = vst [vmem:[#allocation0 + $0x78] sm:$0xff] %v58_v8  ;;  %v93_v15 = vrot.slane %v92_v13, 1  ;;  %v106_v16 = vld [vmem:[#allocation0 + $0x37] ss:$-1 sm:$0xff] }
   0x6   :  { %66 = vst [vmem:[#allocation1] sm:$0xff] %v65_v10  ;;  %v107_v17 = vrot.slane %v106_v16, 1  ;;  %v120_v18 = vld [vmem:[#allocation0 + $0x47] ss:$-1 sm:$0xff]  ;;  %v134_v19 = vld [vmem:[#allocation0 + $0x57] ss:$-1 sm:$0xff] }
   0x7   :  { %80 = vst [vmem:[#allocation1 + $0x8] sm:$0xff] %v79_v14  ;;  %94 = vst [vmem:[#allocation1 + $0x10] sm:$0xff] %v93_v15  ;;  %v121_v20 = vrot.slane %v120_v18, 1  ;;  %v135_v21 = vrot.slane %v134_v19, 1  ;;  %v148_v22 = vld [vmem:[#allocation0 + $0x67] ss:$-1 sm:$0xff] }
   0x8   :  { %v162_v23 = vld [vmem:[#allocation0 + $0x77] ss:$-1 sm:$0xff]  ;;  %108 = vst [vmem:[#allocation1 + $0x18] sm:$0xff] %v107_v17  ;;  %v149_v24 = vrot.slane %v148_v22, 1 }
   0x9   :  { %v163_v25 = vrot.slane %v162_v23, 1  ;;  %v69_v26 = vld [vmem:[#allocation0 + $0xf] ss:$-1 sm:$0xff]  ;;  %v83_v27 = vld [vmem:[#allocation0 + $0x1f] ss:$-1 sm:$0xff]  ;;  %122 = vst [vmem:[#allocation1 + $0x20] sm:$0xff] %v121_v20 }
   0xa   :  { %v97_v28 = vld [vmem:[#allocation0 + $0x2f] ss:$-1 sm:$0xff]  ;;  %136 = vst [vmem:[#allocation1 + $0x28] sm:$0xff] %v135_v21  ;;  %v70_v29 = vrot.slane %v69_v26, 1  ;;  %v84_v30 = vrot.slane %v83_v27, 1  ;;  %150 = vst [vmem:[#allocation1 + $0x30] sm:$0xff] %v149_v24 }
   0xb   :  { %v98_v31 = vrot.slane %v97_v28, 1  ;;  %v111_v32 = vld [vmem:[#allocation0 + $0x3f] ss:$-1 sm:$0xff]  ;;  %164 = vst [vmem:[#allocation1 + $0x38] sm:$0xff] %v163_v25  ;;  %v125_v34 = vld [vmem:[#allocation0 + $0x4f] ss:$-1 sm:$0xff] }
   0xc   :  { %v112_v33 = vrot.slane %v111_v32, 1  ;;  %v139_v35 = vld [vmem:[#allocation0 + $0x5f] ss:$-1 sm:$0xff]  ;;  %74 = vst.msk [vmem:[#allocation1] sm:$0xff] %vm73_vm0, %v70_v29  ;;  %88 = vst.msk [vmem:[#allocation1 + $0x8] sm:$0xff] %vm73_vm0, %v84_v30  ;;  %v126_v36 = vrot.slane %v125_v34, 1 }
   0xd   :  { %102 = vst.msk [vmem:[#allocation1 + $0x10] sm:$0xff] %vm73_vm0, %v98_v31  ;;  %v140_v37 = vrot.slane %v139_v35, 1  ;;  %v153_v38 = vld [vmem:[#allocation0 + $0x6f] ss:$-1 sm:$0xff]  ;;  %v167_v39 = vld [vmem:[#allocation0 + $0x7f] ss:$-1 sm:$0xff] }
   0xe   :  { %116 = vst.msk [vmem:[#allocation1 + $0x18] sm:$0xff] %vm73_vm0, %v112_v33  ;;  %v154_v40 = vrot.slane %v153_v38, 1  ;;  %v168_v41 = vrot.slane %v167_v39, 1  ;;  %130 = vst.msk [vmem:[#allocation1 + $0x20] sm:$0xff] %vm73_vm0, %v126_v36 }
   0xf   :  { %144 = vst.msk [vmem:[#allocation1 + $0x28] sm:$0xff] %vm73_vm0, %v140_v37 }
  0x10   :  { %158 = vst.msk [vmem:[#allocation1 + $0x30] sm:$0xff] %vm73_vm0, %v154_v40  ;;  %172 = vst.msk [vmem:[#allocation1 + $0x38] sm:$0xff] %vm73_vm0, %v168_v41 }
  0x13   :  { %v214_v42 = vld [vmem:[#allocation1] sm:$0xff]  ;;  %v216_v43 = vld [vmem:[#allocation1 + $0x8] sm:$0xff] }
  0x14   :  { %v218_v44 = vld [vmem:[#allocation1 + $0x10] sm:$0xff]  ;;  %215 = vst [vmem:[%s330_s1] sm:$0xff] %v214_v42  ;;  %217 = vst [vmem:[%s330_s1 + $0x8] sm:$0xff] %v216_v43 }
  0x15   :  { %219 = vst [vmem:[%s330_s1 + $0x10] sm:$0xff] %v218_v44  ;;  %v220_v45 = vld [vmem:[#allocation1 + $0x18] sm:$0xff]  ;;  %v222_v46 = vld [vmem:[#allocation1 + $0x20] sm:$0xff] }
  0x16   :  { %221 = vst [vmem:[%s330_s1 + $0x18] sm:$0xff] %v220_v45  ;;  %v224_v47 = vld [vmem:[#allocation1 + $0x28] sm:$0xff]  ;;  %223 = vst [vmem:[%s330_s1 + $0x20] sm:$0xff] %v222_v46 }
  0x17   :  { %225 = vst [vmem:[%s330_s1 + $0x28] sm:$0xff] %v224_v47  ;;  %v226_v48 = vld [vmem:[#allocation1 + $0x30] sm:$0xff]  ;;  %v228_v49 = vld [vmem:[#allocation1 + $0x38] sm:$0xff] }
  0x18   :  { %227 = vst [vmem:[%s330_s1 + $0x30] sm:$0xff] %v226_v48  ;;  %229 = vst [vmem:[%s330_s1 + $0x38] sm:$0xff] %v228_v49 }

</bundles_post_ra>
